<compile_context>
chip_gen: v5e
topology: v5e:2x2
jax: 0.10.0
libtpu: 0.0.40
codegen_flags: <defaults>
</compile_context>

<pallas_src>
import jax
import jax.numpy as jnp
from jax.experimental import pallas as pl
from jax.experimental.pallas import tpu as pltpu


# ----------------------------- helpers --------------------------------------

def _round_up(v, m):
    return ((v + m - 1) // m) * m


def _sublane_multiple(dtype):
    # 8 sublanes of 32-bit; sub-32-bit dtypes pack along sublanes.
    return max(8, 32 // jnp.dtype(dtype).itemsize)


def _vmem_cap_bytes():
    # ~75% of the physical per-core VMEM (v7x: 64MiB -> ~48MiB, v5e/v6e:
    # 128MiB -> ~96MiB), leaving headroom for compiler temporaries.
    try:
        info = pltpu.get_tpu_info()
        phys = int(getattr(info, "vmem_capacity_bytes", 64 << 20))
    except Exception:
        phys = 64 << 20
    return int(0.75 * phys)


# ----------------------------- kernels --------------------------------------

def _highway_resident_kernel(x_ref, w_ref, b_ref, o_ref):
    # x: (tb, H) ; w: (H, 2H) = [Wn^T | Wg^T] ; b: (1, 2H) = [bn | bg]
    h = o_ref.shape[1]
    x = x_ref[...]
    xm = x.astype(w_ref.dtype)          # match MXU dtype (bf16 stays bf16)
    y = jnp.dot(xm, w_ref[...], preferred_element_type=jnp.float32)
    y = y + b_ref[...].astype(jnp.float32)
    normal = jnp.maximum(y[:, :h], 0.0)
    gate = jax.nn.sigmoid(y[:, h:])
    x_f32 = x.astype(jnp.float32)
    o_ref[...] = (x_f32 + gate * (normal - x_f32)).astype(o_ref.dtype)


def _highway_tiled_kernel(x_ref, wn_ref, wg_ref, bn_ref, bg_ref, o_ref):
    # x: (tb, H) full-K ; wn/wg: (H, tn) column blocks ; bn/bg: (1, tn)
    tn = o_ref.shape[1]
    j = pl.program_id(1)
    x = x_ref[...]
    xm = x.astype(wn_ref.dtype)
    yn = jnp.dot(xm, wn_ref[...], preferred_element_type=jnp.float32)
    yn = yn + bn_ref[...].astype(jnp.float32)
    yg = jnp.dot(xm, wg_ref[...], preferred_element_type=jnp.float32)
    yg = yg + bg_ref[...].astype(jnp.float32)
    normal = jnp.maximum(yn, 0.0)
    gate = jax.nn.sigmoid(yg)
    col = pl.multiple_of(j * tn, 128)           # tn divides H -> in-bounds slice
    x_cols = x_ref[:, pl.ds(col, tn)].astype(jnp.float32)
    o_ref[...] = (x_cols + gate * (normal - x_cols)).astype(o_ref.dtype)


# ----------------------------- wrappers -------------------------------------

def prepare_highway_params(wn, bn, wg, bg, *, param_dtype=None, force_tiled=False):
    """One-time (hoisted) fusion of torch-style Linear params.

    wn/wg: (H, H) torch [out, in]; bn/bg: (H,). Returns an opaque params tuple
    consumed by highway_cell_apply. Call once, reuse across forward passes.
    """
    H_out, H_in = wn.shape
    assert H_in == H_out and wg.shape == (H_out, H_in), "residual requires in==out"
    H = H_in
    dt = jnp.dtype(param_dtype) if param_dtype is not None else jnp.dtype(wn.dtype)
    cap = _vmem_cap_bytes()
    fused_w_bytes = 2 * H * H * dt.itemsize
    use_tiled = force_tiled or (fused_w_bytes > int(0.6 * cap))
    if use_tiled and H % 128 == 0:
        return ("tiled",
                wn.T.astype(dt), wg.T.astype(dt),
                bn.reshape(1, H).astype(dt), bg.reshape(1, H).astype(dt))
    # Fully resident fused weight: one lane-dense (H, 2H) matmul per batch tile.
    w = jnp.concatenate([wn.T, wg.T], axis=1).astype(dt)      # (H, 2H)
    b = jnp.concatenate([bn, bg]).reshape(1, 2 * H).astype(dt)
    return ("resident", w, b)


def highway_cell_apply(x, params, *, tile_b=512, tile_n=512):
    """x: (B, H); params from prepare_highway_params."""
    B, H = x.shape
    mode = params[0]
    sub = _sublane_multiple(x.dtype)
    cap = _vmem_cap_bytes()
    x_it = jnp.dtype(x.dtype).itemsize

    # Batch tile: sublane multiple, <= rounded batch, and <= ceil(B/2) so the
    # 'parallel' batch axis has at least 2 steps (v7x megacore sharding).
    tb = min(int(tile_b), _round_up(B, sub))
    if B > sub:
        tb = min(tb, _round_up(pl.cdiv(B, 2), sub))
    tb = max(sub, (tb // sub) * sub)

    if mode == "resident":
        _, w, b = params
        w_it = jnp.dtype(w.dtype).itemsize
        assert w.shape == (H, 2 * H)

        def est_bytes(t):
            return (2 * t * H * x_it            # x tiles, double buffered
                    + 2 * t * H * x_it          # out tiles, double buffered
                    + H * 2 * H * w_it          # fused weight, Buffered(1)
                    + 2 * 2 * H * w_it          # fused bias
                    + 3 * t * 2 * H * 4)        # f32 y / gate,normal / x_f32 slabs

        while tb > sub and est_bytes(tb) > cap:
            tb = max(sub, ((tb // 2) // sub) * sub)

        grid = (pl.cdiv(B, tb),)
        vmem_limit = min(max(int(1.3 * est_bytes(tb)) + (2 << 20), 32 << 20), cap)
        cost = pl.CostEstimate(
            flops=4 * B * H * H,
            transcendentals=B * H,
            bytes_accessed=2 * B * H * x_it + 2 * H * H * w_it + 2 * H * w_it)

        return pl.pallas_call(
            _highway_resident_kernel,
            out_shape=jax.ShapeDtypeStruct((B, H), x.dtype),
            grid_spec=pltpu.PrefetchScalarGridSpec(
                num_scalar_prefetch=0,
                grid=grid,
                in_specs=[
                    pl.BlockSpec((tb, H), lambda i: (i, 0)),          # x tile
                    # Constant block index -> single-buffer the resident weight.
                    # TODO(synk): verify in the bundle dump that Buffered(1) does
                    # not re-issue the weight DMA every grid step.
                    pl.BlockSpec((H, 2 * H), lambda i: (0, 0),
                                 pipeline_mode=pl.Buffered(1)),        # fused W
                    pl.BlockSpec((1, 2 * H), lambda i: (0, 0),
                                 pipeline_mode=pl.Buffered(1)),        # fused b
                ],
                out_specs=pl.BlockSpec((tb, H), lambda i: (i, 0)),
            ),
            compiler_params=pltpu.CompilerParams(
                dimension_semantics=("parallel",),
                vmem_limit_bytes=vmem_limit,
            ),
            cost_estimate=cost,
        )(x, w, b)

    # ---- mode == "tiled": column-tiled weights for large H ------------------
    _, wn_t, wg_t, bn2, bg2 = params
    w_it = jnp.dtype(wn_t.dtype).itemsize
    assert wn_t.shape == (H, H) and H % 128 == 0

    tn = min(int(tile_n), H)
    tn = max(128, (tn // 128) * 128)
    while H % tn:                       # tn must divide H (in-bounds residual slice)
        tn -= 128

    def est_bytes(t, n):
        return (2 * t * H * x_it                # x tiles (full K)
                + 2 * t * n * x_it              # out tiles
                + 2 * 2 * H * n * w_it          # wn/wg column blocks, double buffered
                + 4 * n * w_it                  # bias blocks
                + 3 * t * n * 4)                # f32 intermediates

    while tb > sub and est_bytes(tb, tn) > cap:
        tb = max(sub, ((tb // 2) // sub) * sub)

    grid = (pl.cdiv(B, tb), H // tn)
    vmem_limit = min(max(int(1.3 * est_bytes(tb, tn)) + (2 << 20), 32 << 20), cap)
    cost = pl.CostEstimate(
        flops=4 * B * H * H,
        transcendentals=B * H,
        bytes_accessed=2 * B * H * x_it + 2 * H * H * w_it + 2 * H * w_it)

    return pl.pallas_call(
        _highway_tiled_kernel,
        out_shape=jax.ShapeDtypeStruct((B, H), x.dtype),
        grid_spec=pltpu.PrefetchScalarGridSpec(
            num_scalar_prefetch=0,
            grid=grid,
            in_specs=[
                pl.BlockSpec((tb, H), lambda i, j: (i, 0)),    # x (full K), reused over j
                pl.BlockSpec((H, tn), lambda i, j: (0, j)),    # Wn^T column block
                pl.BlockSpec((H, tn), lambda i, j: (0, j)),    # Wg^T column block
                pl.BlockSpec((1, tn), lambda i, j: (0, j)),    # bn block
                pl.BlockSpec((1, tn), lambda i, j: (0, j)),    # bg block
            ],
            out_specs=pl.BlockSpec((tb, tn), lambda i, j: (i, j)),
        ),
        compiler_params=pltpu.CompilerParams(
            dimension_semantics=("parallel", "arbitrary"),
            vmem_limit_bytes=vmem_limit,
        ),
        cost_estimate=cost,
    )(x, wn_t, wg_t, bn2, bg2)


# ----------------------------- test harness ---------------------------------

if __name__ == "__main__":
    key = jax.random.PRNGKey(0)
    kx, kwn, kbn, kwg = jax.random.split(key, 4)

    HI = jax.lax.Precision.HIGHEST

    def reference(x, wn, bn, wg, bg):
        normal = jax.nn.relu(jnp.dot(x, wn.T, precision=HI) + bn)
        gate = jax.nn.sigmoid(jnp.dot(x, wg.T, precision=HI) + bg)
        return gate * normal + (1.0 - gate) * x

    # --- test 1: f32, resident fused-weight path -----------------------------
    B, H = 64, 128
    gate_bias = -1.0
    x = jax.random.normal(kx, (B, H), dtype=jnp.float32)
    wn = jax.random.normal(kwn, (H, H), dtype=jnp.float32) * 0.1
    bn = jax.random.normal(kbn, (H,), dtype=jnp.float32) * 0.1
    wg = jax.random.normal(kwg, (H, H), dtype=jnp.float32) * 0.1
    bg = jnp.full((H,), gate_bias, dtype=jnp.float32)

    params = prepare_highway_params(wn, bn, wg, bg)   # hoisted one-time fusion
    out = highway_cell_apply(x, params)
    jax.block_until_ready(out)
    ref = reference(x, wn, bn, wg, bg)
    assert jnp.allclose(out, ref, atol=1e-4, rtol=1e-4), "f32 resident mismatch"

    # --- test 2: bf16 params + bf16 x (native bf16 MXU path) -----------------
    xb = x.astype(jnp.bfloat16)
    params_bf16 = prepare_highway_params(wn, bn, wg, bg, param_dtype=jnp.bfloat16)
    out_b = highway_cell_apply(xb, params_bf16)
    jax.block_until_ready(out_b)
    ref_b = reference(xb.astype(jnp.float32),
                      wn.astype(jnp.bfloat16).astype(jnp.float32),
                      bn.astype(jnp.bfloat16).astype(jnp.float32),
                      wg.astype(jnp.bfloat16).astype(jnp.float32),
                      bg.astype(jnp.bfloat16).astype(jnp.float32))
    assert jnp.allclose(out_b.astype(jnp.float32), ref_b, atol=7e-2, rtol=7e-2), \
        "bf16 path mismatch"

    # --- test 3: column-tiled weight path (forced; used for large H) ---------
    B2, H2 = 48, 256
    k2 = jax.random.split(key, 5)
    x2 = jax.random.normal(k2[0], (B2, H2), dtype=jnp.float32)
    wn2 = jax.random.normal(k2[1], (H2, H2), dtype=jnp.float32) * 0.05
    bn2 = jax.random.normal(k2[2], (H2,), dtype=jnp.float32) * 0.1
    wg2 = jax.random.normal(k2[3], (H2, H2), dtype=jnp.float32) * 0.05
    bg2 = jnp.full((H2,), gate_bias, dtype=jnp.float32)
    params2 = prepare_highway_params(wn2, bn2, wg2, bg2, force_tiled=True)
    out2 = highway_cell_apply(x2, params2, tile_n=128)
    jax.block_until_ready(out2)
    ref2 = reference(x2, wn2, bn2, wg2, bg2)
    assert jnp.allclose(out2, ref2, atol=2e-4, rtol=2e-4), "tiled path mismatch"

    print("KERNEL_OK")
</pallas_src>

<mosaic_0001>
module attributes {stable_mosaic.version = 11 : i64} {
  func.func @_highway_resident_kernel(%arg0: i32, %arg1: memref<32x128xf32, #tpu.memory_space<vmem>>, %arg2: memref<128x256xf32, #tpu.memory_space<vmem>>, %arg3: memref<1x256xf32, #tpu.memory_space<vmem>>, %arg4: memref<32x128xf32, #tpu.memory_space<vmem>>) attributes {dimension_semantics = [#tpu.dimension_semantics<parallel>], iteration_bounds = array<i64: 2>, scalar_prefetch = 0 : i64, scratch_operands = 0 : i64, tpu.core_type = #tpu.core_type<tc>, window_params = [{transform_indices = @transform_0, window_bounds = array<i64: 32, 128>}, {pipeline_mode = #tpu.pipeline_mode<synchronous>, transform_indices = @transform_1, window_bounds = array<i64: 128, 256>}, {pipeline_mode = #tpu.pipeline_mode<synchronous>, transform_indices = @transform_2, window_bounds = array<i64: 1, 256>}, {transform_indices = @transform_3, window_bounds = array<i64: 32, 128>}]} {
    %c0 = arith.constant 0 : index
    %c0_0 = arith.constant 0 : index
    %0 = vector.load %arg1[%c0, %c0_0] : memref<32x128xf32, #tpu.memory_space<vmem>>, vector<32x128xf32>
    %c0_1 = arith.constant 0 : index
    %c0_2 = arith.constant 0 : index
    %1 = vector.load %arg2[%c0_1, %c0_2] : memref<128x256xf32, #tpu.memory_space<vmem>>, vector<128x256xf32>
    %cst = arith.constant dense<0.000000e+00> : vector<32x256xf32>
    %2 = tpu.matmul %0, %1, %cst {dimension_numbers = #tpu.dot_dimension_numbers<[1], [0], [0], [1], [0, 0, 1, 1], [], []>} : vector<32x128xf32>, vector<128x256xf32>, vector<32x256xf32> -> vector<32x256xf32>
    %c0_3 = arith.constant 0 : index
    %c0_4 = arith.constant 0 : index
    %3 = vector.load %arg3[%c0_3, %c0_4] : memref<1x256xf32, #tpu.memory_space<vmem>>, vector<1x256xf32>
    %4 = vector.broadcast %3 : vector<1x256xf32> to vector<32x256xf32>
    %5 = arith.addf %2, %4 : vector<32x256xf32>
    %6 = vector.extract_strided_slice %5 {offsets = [0, 0], sizes = [32, 128], strides = [1, 1]} : vector<32x256xf32> to vector<32x128xf32>
    %cst_5 = arith.constant 0.000000e+00 : f32
    %7 = vector.broadcast %cst_5 : f32 to vector<32x128xf32>
    %8 = arith.maximumf %6, %7 : vector<32x128xf32>
    %9 = vector.extract_strided_slice %5 {offsets = [0, 128], sizes = [32, 128], strides = [1, 1]} : vector<32x256xf32> to vector<32x128xf32>
    %10 = arith.negf %9 : vector<32x128xf32>
    %11 = math.exp %10 : vector<32x128xf32>
    %cst_6 = arith.constant 1.000000e+00 : f32
    %12 = vector.broadcast %cst_6 : f32 to vector<32x128xf32>
    %13 = arith.addf %12, %11 : vector<32x128xf32>
    %14 = arith.divf %12, %13 : vector<32x128xf32>
    %15 = arith.subf %8, %0 : vector<32x128xf32>
    %16 = arith.mulf %14, %15 : vector<32x128xf32>
    %17 = arith.addf %0, %16 : vector<32x128xf32>
    %c0_7 = arith.constant 0 : index
    %c0_8 = arith.constant 0 : index
    %18 = vector.load %arg4[%c0_7, %c0_8] : memref<32x128xf32, #tpu.memory_space<vmem>>, vector<32x128xf32>
    tpu.vector_store %arg4[%c0_7, %c0_8], %17 {strides = array<i32>} : memref<32x128xf32, #tpu.memory_space<vmem>>, vector<32x128xf32>,
    return
  }
  func.func @transform_0(%arg0: i32) -> (i32, i32) {
    %c0_i32 = arith.constant 0 : i32
    %c0_i32_0 = arith.constant 0 : i32
    return %arg0, %c0_i32 : i32, i32
  }
  func.func @transform_1(%arg0: i32) -> (i32, i32) {
    %c0_i32 = arith.constant 0 : i32
    %c0_i32_0 = arith.constant 0 : i32
    %c0_i32_1 = arith.constant 0 : i32
    return %c0_i32, %c0_i32_0 : i32, i32
  }
  func.func @transform_2(%arg0: i32) -> (i32, i32) {
    %c0_i32 = arith.constant 0 : i32
    %c0_i32_0 = arith.constant 0 : i32
    %c0_i32_1 = arith.constant 0 : i32
    return %c0_i32, %c0_i32_0 : i32, i32
  }
  func.func @transform_3(%arg0: i32) -> (i32, i32) {
    %c0_i32 = arith.constant 0 : i32
    %c0_i32_0 = arith.constant 0 : i32
    return %arg0, %c0_i32 : i32, i32
  }
}

</mosaic_0001>

<bundles_post_ra>
// kernel: tpu_custom_call.1
= control target key start
LH: loop header
LB: loop body
LE: loop exit
PB: predicated region body
PF: predicated region fallthrough
CT: control target
= control target key end

     0   :  { %8 = vsyncpa [#allocation3], 0  ;;  %s1062_s0 = inlined_call_operand.hbm [shape: f32[64,128], index: 0, kind: input, shape index: {}]   ;;  %s1063_s1 = inlined_call_operand.hbm [shape: f32[128,256], index: 1, kind: input, shape index: {}]   ;;  %s1064_s2 = inlined_call_operand.hbm [shape: f32[1,256], index: 2, kind: input, shape index: {}]   ;;  %s1065_s3 = inlined_call_operand.hbm [shape: f32[64,128], index: 3, kind: output, shape index: {}]  }
   0x1   :  { %10 = vsyncpa [#allocation3 + $0x1], 0 }
   0x2   :  { %11 = vsyncpa [#allocation6], 0 }
   0x3   :  { %12 = vsyncpa [#allocation4], 0 }
   0x4   :  { %14 = vsyncpa [#allocation4 + $0x1], 0  ;;  %s863_s12 = smov 0   ;;  %s865_s13 = smov 0  }
   0x5   :  { %s867_s14 = smov 0   ;;  %s869_s15 = smov 0  }
   0x6 LB: > { %s884_s16 = sadd.s32 4294967295, %s833_s15   ;;  %s528_s17 = sadd.s32 4294967294, %s833_s15   ;;  %s833_s15 = sphi %s869_s15, %s1075_s15   ;;  %s829_s14 = sphi %s867_s14, %s1074_s14   ;;  %s825_s13 = sphi %s865_s13, %s1073_s13   ;;  %s821_s12 = sphi %s863_s12, %s1072_s12  }
   0x7   : > { %p40_p0 = scmp.ne.s32.totalorder %s825_s13, %s821_s12  ;;  %p41_p1 = scmp.eq.s32.totalorder %s884_s16, 0 }
   0x8   : > { %p106_p2 = scmp.eq.s32.totalorder %s884_s16, 1  ;;  %p112_p3 = scmp.eq.s32.totalorder %s528_s17, 1 }
   0x9   : > { %p893_p4 = por %p41_p1, %p40_p0  ;;  %p529_p5 = scmp.ge.s32.totalorder %s833_s15, 1 }
   0xa   : > { %p898_p6 = por %p112_p3, %p40_p0  ;;  %p119_p7 = scmp.lt.s32.totalorder %s833_s15, 3 }
   0xb   : > { %s130_s22 = sshll.u32 %s1063_s1, 4  ;;  %s835_s24 = smov [#allocation5]   ;;  %s131_s22 = int_to_ptr.hbm [resolvable:$true] %s130_s22 }
   0xc   : > { %p906_p8 = pnand %p529_p5, %p119_p7  ;;  %s132_s25 = sshll.u32 %s835_s24, 4  ;;  %s133_s25 = int_to_ptr.vmem [resolvable:$true] %s132_s25 }
   0xd   : > { %s145_s28 = sshll.u32 %s1064_s2, 4  ;;  %s836_s29 = smov 256   ;;  %s146_s28 = int_to_ptr.hbm [resolvable:$true] %s145_s28 }
   0xe   : > { %p596_p9 = pneg %p906_p8  ;;  %s837_s30 = smov 16  }
   0xf   : > { %s838_s4 = smov [#allocation7]   ;;  %s919_s6 = sadd.s32 1, %s833_s15  }
  0x10   : > { %p597_p10 = pnand %p596_p9, %p41_p1  ;;  %s147_s5 = sshll.u32 %s838_s4, 4  ;;  %s148_s5 = int_to_ptr.vmem [resolvable:$true] %s147_s5 }
  0x11   : > { %s27_s7 = sadd.s32 1, %s829_s14  ;;  %s24_s8 = ssub.s32 %s833_s15, %s919_s6 }
  0x12   : > { %599 = dma.hbm_to_vmem [thread:$0]  (!%p597_p10), %s131_s22, 4096, %s133_s25, [#allocation6], %s836_s29, %s836_s29, %s837_s30  }
  0x13   : > { %602 = dma.hbm_to_vmem [thread:$0]  (!%p597_p10), %s146_s28, 32, %s148_s5, [#allocation6]  }
  0x14   : > { %p34_p12 = scmp.ne.s32.totalorder %s829_s14, %s825_s13  ;;  %p25_p13 = scmp.eq.s32.totalorder %s24_s8, 0 }
  0x15   : > { %p35_p0 = scmp.eq.s32.totalorder %s833_s15, 0  ;;  %p613_p5 = scmp.lt.s32.totalorder %s833_s15, 2 }
  0x16   : > { %p929_p3 = por %p106_p2, %p34_p12  ;;  %s158_s11 = sand.u32 1, %s829_s14  }
  0x17   : > { %s935_s10 = scalar_select %p25_p13, %s829_s14, %s27_s7  }
  0x18   : > { %p36_p7 = por %p35_p0, %p34_p12  ;;  %s533_s17 = sshll.u32 %s158_s11, 5 }
  0x19   : > { %s550_s20 = sshll.u32 %s833_s15, 5  ;;  %s162_s25 = scalar_lea.vmem [#allocation2], %s533_s17 }
  0x1a   : > { %s167_s24 = scalar_lea.hbm %s1062_s0, %s550_s20  ;;  %s170_s26 = sshll.u32 %s162_s25, 4  ;;  %s171_s26 = int_to_ptr.vmem [resolvable:$true] %s170_s26 }
  0x1b   : > { %s168_s27 = sshll.u32 %s167_s24, 4  ;;  %p942_p2 = pnand %p613_p5, %p36_p7  ;;  %s169_s27 = int_to_ptr.hbm [resolvable:$true] %s168_s27 }
  0x1c   : > { %s159_s29 = scalar_lea.sflag [#allocation3], %s158_s11  ;;  %s733_s30 = sshra.s32 %s169_s27, 4  ;;  %s734_s30 = int_to_ptr.hbm [resolvable:$true] %s733_s30 }
  0x1d   : > { %s735_s4 = scalar_lea.hbm %s734_s30, 32  ;;  %p737_p10 = pneg %p942_p2 }
  0x1e   : > { %p736_p9 = scmp.ne.s32.totalorder %s734_s30, %s735_s4  ;;  %s740_s8 = scalar_lea.hbm %s1062_s0, 64 }
  0x1f   : > { %p741_p0 = scmp.lt.s32.totalorder %s734_s30, %s1062_s0  ;;  %p742_p5 = scmp.lt.s32.totalorder %s740_s8, %s735_s4 }
  0x20   : > { %p738_p12 = pnand %p737_p10, %p736_p9 }
  0x21   : > { %p743_p7 = por %p742_p5, %p741_p0 }
  0x22   : > { %p739_p13 = pneg %p738_p12 }
  0x24   : > { %p744_p11 = pnand %p743_p7, %p739_p13 }
  0x26   : > { %747 = shalt.err (!%p744_p11)
}
  0x27   : > { %s839_s11 = smov 128   ;;  %s840_s21 = smov 8  }
  0x28   : > { %606 = dma.hbm_to_vmem [thread:$0]  (!%p942_p2), %s169_s27, 512, %s171_s26, %s159_s29, %s839_s11, %s839_s11, %s840_s21  }
  0x29   : > { %182 = sbr.rel (%p906_p8) target bundleno = 259 (0x103), region = 32  ;;  %s959_s22 = sand.u32 (!%p906_p8), 1, %s825_s13  }
  0x2a   : > { %s537_s24 = sshll.u32 (!%p906_p8), %s959_s22, 5  ;;  %s185_s25 = scalar_lea.sflag (!%p906_p8), [#allocation3], %s959_s22 }
  0x2b   : > { %s965_s30 = scalar_lea.vmem (!%p906_p8), [#allocation2], %s537_s24 }
  0x2e   : > { %808 = dma.done.wait (%p893_p4), %s185_s25, 512  }
  0x2f   : > { %810 = vsyncadd (%p893_p4), %s185_s25, 4294966784 }
  0x30   : > { %812 = dma.done.wait (%p41_p1), [#allocation6], 4128  }
  0x31   : > { %814 = vsyncadd (%p41_p1), [#allocation6], 4294963168  ;;  %v259_v0 = vld [vmem:[#allocation5 + $0xf8] sm:$0xff]  ;;  %v257_v1 = vld [vmem:[#allocation5 + $0xe8] sm:$0xff]  ;;  %s1013_s18 = scalar_lea.vmem [#allocation8], %s537_s24  ;;  %s551_s23 = sshll.u32 %s884_s16, 5 }
  0x32   : > { %295 = vmatpush.msra.mxu1 %v259_v0  ;;  %568 = vmatpush.msra.mxu3 %v259_v0  ;;  %v255_v2 = vld [vmem:[#allocation5 + $0xd8] sm:$0xff]  ;;  %v253_v3 = vld [vmem:[#allocation5 + $0xc8] sm:$0xff]  ;;  %v258_v4 = vld [vmem:[#allocation5 + $0xf0] sm:$0xff]  ;;  %s432_s28 = scalar_lea.hbm %s1065_s3, %s551_s23  ;;  %s433_s16 = sshll.u32 %s1013_s18, 4  ;;  %s434_s16 = int_to_ptr.vmem [resolvable:$true] %s433_s16 }
  0x33   : > { %v256_v5 = vld [vmem:[#allocation5 + $0xe0] sm:$0xff]  ;;  %v251_v6 = vld [vmem:[#allocation5 + $0xb8] sm:$0xff]  ;;  %266 = vmatpush.msra.mxu0 %v258_v4  ;;  %552 = vmatpush.msra.mxu2 %v258_v4  ;;  %v254_v7 = vld [vmem:[#allocation5 + $0xd0] sm:$0xff]  ;;  %s435_s29 = sshll.u32 %s432_s28, 4  ;;  %s421_s4 = scalar_lea.sflag [#allocation4], %s959_s22  ;;  %s436_s29 = int_to_ptr.hbm [resolvable:$true] %s435_s29 }
  0x34   : > { %296 = vmatpush.msra.mxu1 %v257_v1  ;;  %569 = vmatpush.msra.mxu3 %v257_v1  ;;  %v249_v8 = vld [vmem:[#allocation5 + $0xa8] sm:$0xff]  ;;  %v252_v9 = vld [vmem:[#allocation5 + $0xc0] sm:$0xff]  ;;  %v247_v10 = vld [vmem:[#allocation5 + $0x98] sm:$0xff]  ;;  %s777_s5 = sshra.s32 %s436_s29, 4  ;;  %s783_s20 = scalar_lea.hbm %s1065_s3, 64  ;;  %s778_s5 = int_to_ptr.hbm [resolvable:$true] %s777_s5 }
  0x35   : > { %267 = vmatpush.msra.mxu0 %v256_v5  ;;  %553 = vmatpush.msra.mxu2 %v256_v5  ;;  %v250_v11 = vld [vmem:[#allocation5 + $0xb0] sm:$0xff]  ;;  %v245_v12 = vld [vmem:[#allocation5 + $0x88] sm:$0xff]  ;;  %v248_v13 = vld [vmem:[#allocation5 + $0xa0] sm:$0xff]  ;;  %s779_s7 = scalar_lea.hbm %s778_s5, 32  ;;  %p784_p11 = scmp.lt.s32.totalorder %s778_s5, %s1065_s3 }
  0x36   : > { %297 = vmatpush.msra.mxu1 %v255_v2  ;;  %570 = vmatpush.msra.mxu3 %v255_v2  ;;  %v243_v14 = vld [vmem:[#allocation5 + $0x78] sm:$0xff]  ;;  %v246_v15 = vld [vmem:[#allocation5 + $0x90] sm:$0xff]  ;;  %v241_v16 = vld [vmem:[#allocation5 + $0x68] sm:$0xff]  ;;  %p780_p1 = scmp.ne.s32.totalorder %s778_s5, %s779_s7  ;;  %p785_p2 = scmp.lt.s32.totalorder %s783_s20, %s779_s7 }
  0x37   : > { %268 = vmatpush.msra.mxu0 %v254_v7  ;;  %554 = vmatpush.msra.mxu2 %v254_v7  ;;  %v244_v17 = vld [vmem:[#allocation5 + $0x80] sm:$0xff]  ;;  %v239_v18 = vld [vmem:[#allocation5 + $0x58] sm:$0xff]  ;;  %v242_v19 = vld [vmem:[#allocation5 + $0x70] sm:$0xff] }
  0x38   : > { %298 = vmatpush.msra.mxu1 %v253_v3  ;;  %571 = vmatpush.msra.mxu3 %v253_v3  ;;  %v237_v20 = vld [vmem:[#allocation5 + $0x48] sm:$0xff]  ;;  %v240_v21 = vld [vmem:[#allocation5 + $0x60] sm:$0xff]  ;;  %v235_v22 = vld [vmem:[#allocation5 + $0x38] sm:$0xff]  ;;  %p781_p4 = pnand %p780_p1, %p929_p3  ;;  %p786_p9 = por %p785_p2, %p784_p11 }
  0x39   : > { %269 = vmatpush.msra.mxu0 %v252_v9  ;;  %555 = vmatpush.msra.mxu2 %v252_v9  ;;  %v238_v23 = vld [vmem:[#allocation5 + $0x50] sm:$0xff]  ;;  %v233_v24 = vld [vmem:[#allocation5 + $0x28] sm:$0xff]  ;;  %v236_v25 = vld [vmem:[#allocation5 + $0x40] sm:$0xff] }
  0x3a   : > { %299 = vmatpush.msra.mxu1 %v251_v6  ;;  %572 = vmatpush.msra.mxu3 %v251_v6  ;;  %v231_v26 = vld [vmem:[#allocation5 + $0x18] sm:$0xff]  ;;  %v234_v27 = vld [vmem:[#allocation5 + $0x30] sm:$0xff]  ;;  %v229_v28 = vld [vmem:[#allocation5 + $0x8] sm:$0xff]  ;;  %p782_p8 = pneg %p781_p4 }
  0x3b   : > { %270 = vmatpush.msra.mxu0 %v250_v11  ;;  %556 = vmatpush.msra.mxu2 %v250_v11  ;;  %v976_v29 = vld [vmem:[%s965_s30] sm:$0xff]  ;;  %v979_v30 = vld [vmem:[%s965_s30 + $0x10] sm:$0xff]  ;;  %v984_v34 = vld [vmem:[%s965_s30 + $0x8] sm:$0xff] }
  0x3c   : > { %300 = vmatpush.msra.mxu1 %v249_v8  ;;  %573 = vmatpush.msra.mxu3 %v249_v8  ;;  %v232_v31 = vld [vmem:[#allocation5 + $0x20] sm:$0xff]  ;;  %v230_v32 = vld [vmem:[#allocation5 + $0x10] sm:$0xff]  ;;  %v987_v35 = vld [vmem:[%s965_s30 + $0x18] sm:$0xff]  ;;  %p787_p10 = pnand %p786_p9, %p782_p8 }
  0x3d   : > { %271 = vmatpush.msra.mxu0 %v248_v13  ;;  %557 = vmatpush.msra.mxu2 %v248_v13  ;;  %v228_v33 = vld [vmem:[#allocation5] sm:$0xff] }
  0x3e   : > { %301 = vmatpush.msra.mxu1 %v247_v10  ;;  %574 = vmatpush.msra.mxu3 %v247_v10  ;;  %v260_v36 = vld [vmem:[#allocation7] sm:$0x3] }
  0x3f   : > { %272 = vmatpush.msra.mxu0 %v246_v15  ;;  %558 = vmatpush.msra.mxu2 %v246_v15  ;;  %v263_v37 = vperm.slane %v260_v36, 1  ;;  %v262_v52 = vperm.slane %v260_v36, 0 }
  0x40   : > { %302 = vmatpush.msra.mxu1 %v245_v12  ;;  %575 = vmatpush.msra.mxu3 %v245_v12 }
  0x41   : > { %273 = vmatpush.msra.mxu0 %v244_v17  ;;  %559 = vmatpush.msra.mxu2 %v244_v17 }
  0x42   : > { %303 = vmatpush.msra.mxu1 %v243_v14  ;;  %576 = vmatpush.msra.mxu3 %v243_v14 }
  0x43   : > { %274 = vmatpush.msra.mxu0 %v242_v19  ;;  %560 = vmatpush.msra.mxu2 %v242_v19 }
  0x44   : > { %304 = vmatpush.msra.mxu1 %v241_v16  ;;  %577 = vmatpush.msra.mxu3 %v241_v16 }
  0x45   : > { %275 = vmatpush.msra.mxu0 %v240_v21  ;;  %561 = vmatpush.msra.mxu2 %v240_v21 }
  0x46   : > { %305 = vmatpush.msra.mxu1 %v239_v18  ;;  %578 = vmatpush.msra.mxu3 %v239_v18 }
  0x47   : > { %276 = vmatpush.msra.mxu0 %v238_v23  ;;  %562 = vmatpush.msra.mxu2 %v238_v23 }
  0x48   : > { %306 = vmatpush.msra.mxu1 %v237_v20  ;;  %579 = vmatpush.msra.mxu3 %v237_v20 }
  0x49   : > { %277 = vmatpush.msra.mxu0 %v236_v25  ;;  %563 = vmatpush.msra.mxu2 %v236_v25 }
  0x4a   : > { %307 = vmatpush.msra.mxu1 %v235_v22  ;;  %580 = vmatpush.msra.mxu3 %v235_v22 }
  0x4b   : > { %278 = vmatpush.msra.mxu0 %v234_v27  ;;  %564 = vmatpush.msra.mxu2 %v234_v27 }
  0x4c   : > { %308 = vmatpush.msra.mxu1 %v233_v24  ;;  %581 = vmatpush.msra.mxu3 %v233_v24 }
  0x4d   : > { %279 = vmatpush.msra.mxu0 %v232_v31  ;;  %565 = vmatpush.msra.mxu2 %v232_v31 }
  0x4e   : > { %309 = vmatpush.msra.mxu1 %v231_v26  ;;  %582 = vmatpush.msra.mxu3 %v231_v26 }
  0x4f   : > { %280 = vmatpush.msra.mxu0 %v230_v32  ;;  %566 = vmatpush.msra.mxu2 %v230_v32 }
  0x50   : > { %310 = vmatpush.msra.mxu1 %v229_v28  ;;  %583 = vmatpush.msra.mxu3 %v229_v28 }
  0x51   : > { %311 = vmatmul.f32.vlgmr.msra.gmra.mxu1 %v976_v29  ;;  %317 = vmatmul.f32.vlgmr.msra.gmra.mxu3 %v979_v30 }
  0x52   : > { %281 = vmatpush.msra.mxu0 %v228_v33  ;;  %567 = vmatpush.msra.mxu2 %v228_v33 }
  0x53   : > { %282 = vmatmul.f32.vlgmr.msra.gmra.mxu0 %v976_v29  ;;  %288 = vmatmul.f32.vlgmr.msra.gmra.mxu2 %v979_v30 }
  0x59   : > { %314 = vmatmul.f32.gmra.mxu1 %v984_v34  ;;  %320 = vmatmul.f32.gmra.mxu3 %v987_v35 }
  0x5b   : > { %285 = vmatmul.f32.gmra.mxu0 %v984_v34  ;;  %291 = vmatmul.f32.gmra.mxu2 %v987_v35 }
  0xce   : > { %v312_v38 = vpop.f32.mrf.mxu1 }
  0xcf   : > { %v313_v39 = vadd.f32 %v312_v38, %v263_v37 }
  0xd0   : > { %v283_v49 = vpop.f32.mrf.mxu0 }
  0xd1   : > { %v541_v40 = vmul.f32 -1.442695, %v313_v39  ;;  %v284_v58 = vadd.f32 %v283_v49, %v262_v52 }
  0xd3   : > { %657 = vpow2.f32 %v541_v40  ;;  %v324_v1 = vmax.f32 %v284_v58, 0.0 }
  0xd4   : > { %v318_v41 = vpop.f32.mrf.mxu3 }
  0xd5   : > { %v319_v42 = vadd.f32 %v318_v41, %v263_v37  ;;  %v404_v12 = vsub.f32 %v324_v1, %v976_v29 }
  0xd6   : > { %v315_v43 = vpop.f32.mrf.mxu1  ;;  %v289_v55 = vpop.f32.mrf.mxu2 }
  0xd7   : > { %v543_v44 = vmul.f32 -1.442695, %v319_v42  ;;  %v316_v45 = vadd.f32 %v315_v43, %v263_v37  ;;  %v290_v61 = vadd.f32 %v289_v55, %v262_v52 }
  0xd8   : > { %v286_v63 = vpop.f32.mrf.mxu0 }
  0xd9   : > { %v658_v46 = vpop.eup %657  ;;  %659 = vpow2.f32 %v543_v44  ;;  %v542_v47 = vmul.f32 -1.442695, %v316_v45  ;;  %v326_v4 = vmax.f32 %v290_v61, 0.0  ;;  %v287_v7 = vadd.f32 %v286_v63, %v262_v52 }
  0xda   : > { %v340_v48 = vadd.f32 1.0, %v658_v46 }
  0xdb   : > { %661 = vpow2.f32 %v542_v47  ;;  %v406_v15 = vsub.f32 %v326_v4, %v979_v30  ;;  %v325_v19 = vmax.f32 %v287_v7, 0.0 }
  0xdc   : > { %663 = vrcp.f32 %v340_v48  ;;  %v321_v50 = vpop.f32.mrf.mxu3  ;;  %v353_v2 = vand.u32 2147483647, %v340_v48  ;;  %v355_v3 = vand.u32 2147483648, %v340_v48  ;;  %vm349_vm0 = vweird.f32 %v340_v48 }
  0xdd   : > { %v322_v51 = vadd.f32 %v321_v50, %v263_v37  ;;  %v405_v39 = vsub.f32 %v325_v19, %v984_v34 }
  0xde   : > { %vm354_vm3 = vcmp.eq.f32.partialorder %v353_v2, 8.507059e+37  ;;  %v356_v14 = vor.u32 1.1754944e-38, %v355_v3  ;;  %v292_v20 = vpop.f32.mrf.mxu2 }
  0xdf   : > { %v660_v53 = vpop.eup %659  ;;  %v544_v54 = vmul.f32 -1.442695, %v322_v51  ;;  %v293_v31 = vadd.f32 %v292_v20, %v262_v52 }
  0xe0   : > { %v342_v56 = vadd.f32 1.0, %v660_v53 }
  0xe1   : > { %v662_v57 = vpop.eup %661  ;;  %665 = vpow2.f32 %v544_v54  ;;  %v327_v44 = vmax.f32 %v293_v31, 0.0 }
  0xe2   : > { %v664_v59 = vpop.eup %663  ;;  %667 = vrcp.f32 %v342_v56  ;;  %v995_v60 = vadd.f32 1.0, %v662_v57  ;;  %vm379_vm4 = vweird.f32 %v342_v56  ;;  %v383_v22 = vand.u32 2147483647, %v342_v56 }
  0xe3   : > { %v345_v62 = vmul.f32 %v664_v59, %v340_v48  ;;  %vm350_vm1 = vweird.f32 %v664_v59  ;;  %v385_v23 = vand.u32 2147483648, %v342_v56 }
  0xe4   : > { %669 = vrcp.f32 %v995_v60  ;;  %vm351_vm2 = vmor %vm349_vm0, %vm350_vm1  ;;  %vm364_vm6 = vweird.f32 %v995_v60  ;;  %v368_v27 = vand.u32 2147483647, %v995_v60  ;;  %v370_v28 = vand.u32 2147483648, %v995_v60 }
  0xe5   : > { %v346_v0 = vsub.f32 1.0, %v345_v62  ;;  %v386_v38 = vor.u32 1.1754944e-38, %v385_v23  ;;  %vm384_vm9 = vcmp.eq.f32.partialorder %v383_v22, 8.507059e+37 }
  0xe6   : > { %v371_v43 = vor.u32 1.1754944e-38, %v370_v28  ;;  %vm369_vm11 = vcmp.eq.f32.partialorder %v368_v27, 8.507059e+37 }
  0xe7   : > { %v666_v5 = vpop.eup %665  ;;  %v347_v6 = vmul.f32 %v664_v59, %v346_v0 }
  0xe8   : > { %v668_v8 = vpop.eup %667  ;;  %v998_v9 = vadd.f32 1.0, %v666_v5 }
  0xe9   : > { %v375_v10 = vmul.f32 %v668_v8, %v342_v56  ;;  %v348_v11 = vadd.f32 %v664_v59, %v347_v6  ;;  %vm380_vm5 = vweird.f32 %v668_v8  ;;  %v407_v56 = vsub.f32 %v327_v44, %v987_v35 }
  0xea   : > { %v670_v13 = vpop.eup %669  ;;  %671 = vrcp.f32 %v998_v9  ;;  %vm381_vm8 = vmor %vm379_vm4, %vm380_vm5  ;;  %v398_v49 = vand.u32 2147483647, %v998_v9  ;;  %v400_v50 = vand.u32 2147483648, %v998_v9  ;;  %vm394_vm13 = vweird.f32 %v998_v9 }
  0xeb   : > { %v376_v16 = vsub.f32 1.0, %v375_v10  ;;  %v360_v17 = vmul.f32 %v670_v13, %v995_v60  ;;  %v352_v18 = vsel %vm351_vm2, %v664_v59, %v348_v11  ;;  %vm365_vm7 = vweird.f32 %v670_v13 }
  0xec   : > { %v357_v21 = vsel %vm354_vm3, %v356_v14, %v352_v18  ;;  %vm366_vm10 = vmor %vm364_vm6, %vm365_vm7  ;;  %vm399_vm15 = vcmp.eq.f32.partialorder %v398_v49, 8.507059e+37 }
  0xed   : > { %v361_v24 = vsub.f32 1.0, %v360_v17  ;;  %v408_v25 = vmul.f32 %v404_v12, %v357_v21  ;;  %v377_v26 = vmul.f32 %v668_v8, %v376_v16 }
  0xef   : > { %v412_v32 = vadd.f32 %v408_v25, %v976_v29  ;;  %v378_v33 = vadd.f32 %v668_v8, %v377_v26  ;;  %v362_v36 = vmul.f32 %v670_v13, %v361_v24 }
  0xf0   : > { %v672_v37 = vpop.eup %671 }
  0xf1   : > { %v390_v40 = vmul.f32 %v672_v37, %v998_v9  ;;  %416 = vst [vmem:[%s1013_s18] sm:$0xff] %v412_v32  ;;  %v382_v41 = vsel %vm381_vm8, %v668_v8, %v378_v33  ;;  %v363_v29 = vadd.f32 %v670_v13, %v362_v36  ;;  %vm395_vm12 = vweird.f32 %v672_v37 }
  0xf2   : > { %v387_v42 = vsel %vm384_vm9, %v386_v38, %v382_v41  ;;  %vm396_vm14 = vmor %vm394_vm13, %vm395_vm12 }
  0xf3   : > { %v391_v45 = vsub.f32 1.0, %v390_v40  ;;  %v410_v46 = vmul.f32 %v406_v15, %v387_v42  ;;  %v367_v47 = vsel %vm366_vm10, %v670_v13, %v363_v29 }
  0xf4   : > { %v372_v48 = vsel %vm369_vm11, %v371_v43, %v367_v47 }
  0xf5   : > { %v414_v51 = vadd.f32 %v410_v46, %v979_v30  ;;  %v409_v52 = vmul.f32 %v405_v39, %v372_v48  ;;  %v392_v53 = vmul.f32 %v672_v37, %v391_v45  ;;  %v401_v30 = vor.u32 1.1754944e-38, %v400_v50 }
  0xf7   : > { %418 = vst [vmem:[%s1013_s18 + $0x10] sm:$0xff] %v414_v51  ;;  %v413_v54 = vadd.f32 %v409_v52, %v984_v34  ;;  %v393_v55 = vadd.f32 %v672_v37, %v392_v53 }
  0xf9   : > { %417 = vst [vmem:[%s1013_s18 + $0x8] sm:$0xff] %v413_v54  ;;  %v397_v57 = vsel %vm396_vm14, %v672_v37, %v393_v55 }
  0xfa   : > { %v402_v58 = vsel %vm399_vm15, %v401_v30, %v397_v57 }
  0xfb   : > { %v411_v59 = vmul.f32 %v407_v56, %v402_v58 }
  0xfd   : > { %v415_v34 = vadd.f32 %v411_v59, %v987_v35 }
  0xff   : > { %419 = vst [vmem:[%s1013_s18 + $0x18] sm:$0xff] %v415_v34 }
 0x100   : > { %790 = shalt.err (!%p787_p10)
}
 0x101   : > { %s841_s22 = smov 128   ;;  %s842_s24 = smov 8  }
 0x102   : > { %594 = dma.vmem_to_hbm [thread:$0]  (%p929_p3), %s434_s16, 512, %s436_s29, %s421_s4, %s841_s22, %s841_s22, %s842_s24  }
 0x103 PF: > { %s450_s25 = sand.u32 1, %s821_s12   ;;  %p1071_p12 = scmp.ge.s32.totalorder %s833_s15, 2 }
 0x104   : > { %s451_s30 = scalar_lea.sflag [#allocation4], %s450_s25 }
 0x105   : > { %p608_p13 = pnand %p1071_p12, %p898_p6 }
 0x107   : > { %p609_p0 = pneg %p608_p13 }
 0x109   : > { %816 = dma.done.wait (%p609_p0), %s451_s30, 512  }
 0x10a   : > { %818 = vsyncadd (%p609_p0), %s451_s30, 4294966784  ;;  %p17_p5 = scmp.ge.s32.totalorder %s919_s6, 4   ;;  %s1072_s12 = smov %s825_s13 }
 0x10b   : > { %s1073_s13 = smov %s829_s14  ;;  %s1074_s14 = smov %s935_s10 }
 0x10c   : > { %s1075_s15 = smov %s919_s6  ;;  %19 = sbr.rel (!%p17_p5) target bundleno = 6 (0x6), region = 85 }
 0x111   :  { %457 = vsyncpa [#allocation3], 1 }
 0x112   :  { %459 = vsyncpa [#allocation3 + $0x1], 1 }
 0x113   :  { %460 = vsyncpa [#allocation6], 1 }
 0x114   :  { %461 = vsyncpa [#allocation4], 1 }
 0x115   :  { %463 = vsyncpa [#allocation4 + $0x1], 1 }

</bundles_post_ra>
